<compile_context>
chip_gen: v6e
topology: v6e:2x2x1
jax: 0.10.0
libtpu: 0.0.40
codegen_flags: <defaults>
</compile_context>

<pallas_src>
import functools

import jax
import jax.numpy as jnp
from jax.experimental import pallas as pl
from jax.experimental.pallas import tpu as pltpu


def block_kernel(y_ref, esbd_ref, wqv_ref, bqv_ref, wre_ref, bre_ref,
                 wsqh_ref, mixs_ref, wpool_ref, bsq_ref, bmask_ref,
                 out_ref, etc_scr, *, seq_len):
    # Shapes (demo values):
    #   y    : (Din, B*S)      (16, 128)  columns ordered b*S + s
    #   esbd : (H, B*S, B*E)   block-diagonal e_s^T per head
    #   wqv  : (D+H*D, Din)    fused to_q / to_v weight    bqv: (D+H*D, 1)
    #   wre  : (D, H*D)        bre: (D, 1)
    #   wsqh : (H, D, D)       per-head blocks of the squeeze conv weight
    #   mixs : (H, 1, D)       mix / sqrt (score path)
    #   wpool: (D, D)          sum_h wsq_h * mix_h (pool path folded into squeeze)
    #   bsq  : (D, 1)          bmask: (H*B*E, B*S) 1 where row-batch == col-batch
    #   out  : (D, B*S)        etc_scr: (H*D, B*E) VMEM scratch
    H, BS, BE = esbd_ref.shape
    D = wre_ref.shape[0]
    S = seq_len
    B = BS // S
    E = BE // B

    y = y_ref[...]

    # ---- fused to_q / to_v: ONE MXU pass instead of two (item 1)
    qv = jnp.dot(wqv_ref[...], y, preferred_element_type=jnp.float32) + bqv_ref[...]
    q = qv[:D, :]                                                    # (D, B*S)

    # TODO(synk): PointwiseDropout is an undefined external dependency; treated
    # as identity (inference mode), so `mask` / `regular` are no-ops here.

    # ---- F.avg_pool1d(multi_q, 3, 1, 1), count_include_pad, per-batch windows.
    # multi_q[h] = mix[h][:,None] * q => pool q once; the mix scaling is folded
    # into wpool host-side.  Boundary masks are lane-only: (1, B*S) iota (item 6).
    col = jax.lax.broadcasted_iota(jnp.int32, (1, BS), 1)
    prv = jnp.where(col % S != 0, pltpu.roll(q, 1, 1), 0.0)              # q[:, c-1]
    nxt = jnp.where(col % S != S - 1, pltpu.roll(q, BS - 1, 1), 0.0)     # q[:, c+1]
    pooled_q = (q + prv + nxt) * (1.0 / 3.0)                             # (D, B*S)
    out_base = (jnp.dot(wpool_ref[...], pooled_q, preferred_element_type=jnp.float32)
                + bsq_ref[...])                                          # (D, B*S)

    # ---- etc_v[h, b] = v_hb @ e_s[h, b]^T for every batch at once: the block-
    # diagonal e_s^T makes it one 128-deep dot per head — no transposes, no
    # per-(b, h) loop (items 2 + 12).  Per-head results go to a VMEM scratch.
    ev = []
    for h in range(H):
        v_h = qv[D + h * D:D + (h + 1) * D, :]                           # (D, B*S)
        ev_h = jnp.dot(v_h, esbd_ref[h], preferred_element_type=jnp.float32)  # (D, B*E)
        etc_scr[h * D:(h + 1) * D, :] = ev_h
        ev.append(ev_h)

    # ---- reatten for all batches in one dot (contraction H*D)
    etc_k = (jnp.dot(wre_ref[...], etc_scr[...], preferred_element_type=jnp.float32)
             + bre_ref[...])                                             # (D, B*E)

    # ---- mix / 1/sqrt scaling hoisted out of every loop (item 3): scale the
    # transposed keys once per head; rows ordered (h, b, e).
    etc_kT = etc_k.T                                                     # (B*E, D)
    mk = jnp.concatenate([etc_kT * mixs_ref[h] for h in range(H)], axis=0)  # (H*B*E, D)

    # ---- scores for every (head, batch) pair in ONE MXU pass; cross-batch
    # blocks are junk and are masked after the softmax (item 12).
    scores = jnp.dot(mk, q, preferred_element_type=jnp.float32)          # (H*B*E, B*S)

    # ---- softmax over E inside each (h, b) group, vectorised (item 4)
    sc3 = scores.reshape(H * B, E, BS)
    sc3 = sc3 - jnp.max(sc3, axis=1, keepdims=True)
    p = jnp.exp(sc3)
    inv = pl.reciprocal(jnp.sum(p, axis=1, keepdims=True), approx=False)
    atten = (p * inv).reshape(H * B * E, BS) * bmask_ref[...]            # block-diag mask

    # ---- squeeze weight folded into etc_v once per head (item 5), then ONE
    # output matmul (contraction H*B*E) and a single lane-dense store.
    wev = jnp.concatenate(
        [jnp.dot(wsqh_ref[h], ev[h], preferred_element_type=jnp.float32)
         for h in range(H)], axis=1)                                     # (D, H*B*E)
    out_ref[...] = out_base + jnp.dot(wev, atten, preferred_element_type=jnp.float32)


def block_forward(y, e_s, params):
    """y: (B, Din, S); e_s: (H, B, E, S) (native layout). Returns (B, D, S)."""
    wq, bq, mix, wv, bv, wre, bre, wsq, bsq, sqrt_v = params
    B, Din, S = y.shape
    D = wq.shape[0]
    H = mix.shape[0]
    E = e_s.shape[2]

    # Layout plumbing: fold batch into the lane axis of y / the output.
    y_t = jnp.transpose(y, (1, 0, 2)).reshape(Din, B * S)

    # item 1: fused to_q / to_v weight & bias
    wqv = jnp.concatenate([wq, wv], axis=0)                       # (D+H*D, Din)
    bqv = jnp.concatenate([bq, bv], axis=0).reshape(-1, 1)        # (D+H*D, 1)

    mix2 = mix.reshape(H, D)
    wsq_h = jnp.transpose(wsq.reshape(D, H, D), (1, 0, 2))        # (H, D, D) per-head blocks
    w_pool = jnp.einsum('hod,hd->od', wsq_h, mix2)                # squeeze ∘ (mix ⊙ avgpool) fold
    mixs = (mix2 / sqrt_v).reshape(H, 1, D)                       # 1/sqrt folded (score path)

    # items 2 + 12: block-diagonal e_s^T so etc_v is one full-contraction dot per head
    es_t = jnp.transpose(e_s, (0, 1, 3, 2))                       # (H, B, S, E)
    eye_b = jnp.eye(B, dtype=e_s.dtype)
    es_bd = jnp.einsum('hbse,bc->hbsce', es_t, eye_b).reshape(H, B * S, B * E)
    # TODO(synk): for large B this Bx replication of e_s should revert to per-batch
    # dots (or a gridded batch axis) instead of the block-diagonal operand.

    # block-diagonal batch mask for the fused attention (rows (h,b,e), cols (b',s))
    row_b = (jnp.arange(H * B * E) // E) % B
    col_b = jnp.arange(B * S) // S
    bmask = (row_b[:, None] == col_b[None, :]).astype(jnp.float32)

    bre2 = bre.reshape(D, 1)
    bsq2 = bsq.reshape(D, 1)

    vmem = pl.BlockSpec(memory_space=pltpu.MemorySpace.VMEM)
    out_t = pl.pallas_call(
        functools.partial(block_kernel, seq_len=S),
        out_shape=jax.ShapeDtypeStruct((D, B * S), jnp.float32),
        in_specs=[vmem] * 11,
        out_specs=vmem,
        scratch_shapes=[pltpu.VMEM((H * D, B * E), jnp.float32)],
    )(y_t, es_bd, wqv, bqv, wre, bre2, wsq_h, mixs, w_pool, bsq2, bmask)
    return jnp.transpose(out_t.reshape(D, B, S), (1, 0, 2))


def block_reference(y, e_s, params):
    """Pure-JAX reference of the PyTorch forward (dropout == identity)."""
    wq, bq, mix, wv, bv, wre, bre, wsq, bsq, sqrt_v = params
    B, Din, S = y.shape
    D = wq.shape[0]
    H = mix.shape[0]
    E = e_s.shape[2]
    mix2 = mix.reshape(H, D)

    q = jnp.einsum('oi,bis->bos', wq, y) + bq[None, :, None]
    multi_q = q[:, None] * mix2[None, :, :, None]                        # (B,H,D,S)
    v = jnp.einsum('oi,bis->bos', wv, y) + bv[None, :, None]             # (B,H*D,S)
    etc_v = jnp.stack(
        [jnp.einsum('bds,bes->bde', v[:, h * D:(h + 1) * D], e_s[h]) for h in range(H)],
        axis=1)                                                           # (B,H,D,E)
    etc_k = jnp.einsum('od,bde->boe', wre, etc_v.reshape(B, H * D, E)) + bre[None, :, None]
    scores = jnp.einsum('bde,bhds->bhes', etc_k, multi_q) / sqrt_v
    atten = jax.nn.softmax(scores, axis=-2)
    out_mm = jnp.einsum('bhde,bhes->bhds', etc_v, atten).reshape(B, H * D, S)
    mq = multi_q.reshape(B, H * D, S)
    mqp = jnp.pad(mq, ((0, 0), (0, 0), (1, 1)))
    pooled = (mqp[..., :-2] + mqp[..., 1:-1] + mqp[..., 2:]) / 3.0
    pre = out_mm + pooled
    return jnp.einsum('od,bds->bos', wsq, pre) + bsq[None, :, None]


if __name__ == "__main__":
    # dim_in == dim_out (the PyTorch forward shadows dim_out with y's channel count,
    # so equal dims keep the original slicing semantics exact).
    # B*S = 128 so the folded lane axis is exactly one full vreg lane tile.
    B, DIN, D, H, E, S = 2, 16, 16, 2, 16, 64

    key = jax.random.PRNGKey(0)
    ks = jax.random.split(key, 12)
    y = jax.random.normal(ks[0], (B, DIN, S), jnp.float32)
    e_s = jax.random.normal(ks[1], (H, B, E, S), jnp.float32)

    scale = 0.1
    params = (
        jax.random.normal(ks[2], (D, DIN), jnp.float32) * scale,        # to_q weight
        jax.random.normal(ks[3], (D,), jnp.float32) * scale,            # to_q bias
        jax.random.normal(ks[4], (H, D, 1), jnp.float32),               # mix
        jax.random.normal(ks[5], (D * H, DIN), jnp.float32) * scale,    # to_v weight
        jax.random.normal(ks[6], (D * H,), jnp.float32) * scale,        # to_v bias
        jax.random.normal(ks[7], (D, D * H), jnp.float32) * scale,      # reatten weight
        jax.random.normal(ks[8], (D,), jnp.float32) * scale,            # reatten bias
        jax.random.normal(ks[9], (D, D * H), jnp.float32) * scale,      # squeeze weight
        jax.random.normal(ks[10], (D,), jnp.float32) * scale,           # squeeze bias
        jnp.float32(128.0),                                             # self.sqrt
    )
    # NOTE: trans_k exists in __init__ but is unused in forward; omitted.

    out = jax.block_until_ready(block_forward(y, e_s, params))
    ref = block_reference(y, e_s, params)
    assert out.shape == (B, D, S)
    assert jnp.allclose(out, ref, atol=1e-4, rtol=1e-4), "mismatch vs reference"
    print("KERNEL_OK")
</pallas_src>

<mosaic_0001>
module attributes {stable_mosaic.version = 11 : i64} {
  func.func @block_kernel(%arg0: memref<16x128xf32, #tpu.memory_space<vmem>>, %arg1: memref<2x128x32xf32, #tpu.memory_space<vmem>>, %arg2: memref<48x16xf32, #tpu.memory_space<vmem>>, %arg3: memref<48x1xf32, #tpu.memory_space<vmem>>, %arg4: memref<16x32xf32, #tpu.memory_space<vmem>>, %arg5: memref<16x1xf32, #tpu.memory_space<vmem>>, %arg6: memref<2x16x16xf32, #tpu.memory_space<vmem>>, %arg7: memref<2x1x16xf32, #tpu.memory_space<vmem>>, %arg8: memref<16x16xf32, #tpu.memory_space<vmem>>, %arg9: memref<16x1xf32, #tpu.memory_space<vmem>>, %arg10: memref<64x128xf32, #tpu.memory_space<vmem>>, %arg11: memref<16x128xf32, #tpu.memory_space<vmem>>, %arg12: memref<32x32xf32, #tpu.memory_space<vmem>>) attributes {dimension_semantics = [], scalar_prefetch = 0 : i64, scratch_operands = 1 : i64, tpu.core_type = #tpu.core_type<tc>} {
    %c0 = arith.constant 0 : index
    %c0_0 = arith.constant 0 : index
    %0 = vector.load %arg0[%c0, %c0_0] : memref<16x128xf32, #tpu.memory_space<vmem>>, vector<16x128xf32>
    %c0_1 = arith.constant 0 : index
    %c0_2 = arith.constant 0 : index
    %1 = vector.load %arg2[%c0_1, %c0_2] : memref<48x16xf32, #tpu.memory_space<vmem>>, vector<48x16xf32>
    %cst = arith.constant dense<0.000000e+00> : vector<48x128xf32>
    %2 = tpu.matmul %1, %0, %cst {dimension_numbers = #tpu.dot_dimension_numbers<[1], [0], [0], [1], [0, 0, 1, 1], [], []>} : vector<48x16xf32>, vector<16x128xf32>, vector<48x128xf32> -> vector<48x128xf32>
    %c0_3 = arith.constant 0 : index
    %c0_4 = arith.constant 0 : index
    %3 = vector.load %arg3[%c0_3, %c0_4] : memref<48x1xf32, #tpu.memory_space<vmem>>, vector<48x1xf32>
    %4 = vector.broadcast %3 : vector<48x1xf32> to vector<48x128xf32>
    %5 = arith.addf %2, %4 : vector<48x128xf32>
    %6 = vector.extract_strided_slice %5 {offsets = [0, 0], sizes = [16, 128], strides = [1, 1]} : vector<48x128xf32> to vector<16x128xf32>
    %7 = tpu.iota {dimensions = array<i32: 1>} : vector<1x128xi32>
    %c64_i32 = arith.constant 64 : i32
    %c0_i32 = arith.constant 0 : i32
    %8 = arith.cmpi eq, %c64_i32, %c0_i32 : i32
    %c1_i32 = arith.constant 1 : i32
    %9 = arith.select %8, %c1_i32, %c64_i32 : i32
    %10 = vector.broadcast %9 : i32 to vector<1x128xi32>
    %11 = arith.remsi %7, %10 : vector<1x128xi32>
    %c0_i32_5 = arith.constant 0 : i32
    %12 = vector.broadcast %c0_i32_5 : i32 to vector<1x128xi32>
    %13 = arith.cmpi ne, %11, %12 : vector<1x128xi32>
    %c0_i32_6 = arith.constant 0 : i32
    %14 = vector.broadcast %c0_i32_6 : i32 to vector<1x128xi32>
    %15 = arith.cmpi slt, %11, %14 : vector<1x128xi32>
    %c0_i32_7 = arith.constant 0 : i32
    %16 = arith.cmpi slt, %9, %c0_i32_7 : i32
    %17 = vector.broadcast %16 : i1 to vector<1x128xi1>
    %18 = vector.broadcast %17 : vector<1x128xi1> to vector<1x128xi1>
    %19 = arith.xori %15, %18 : vector<1x128xi1>
    %20 = arith.andi %19, %13 : vector<1x128xi1>
    %21 = vector.broadcast %9 : i32 to vector<1x128xi32>
    %22 = arith.addi %11, %21 : vector<1x128xi32>
    %23 = arith.select %20, %22, %11 : vector<1x128xi1>, vector<1x128xi32>
    %c0_i32_8 = arith.constant 0 : i32
    %24 = vector.broadcast %c0_i32_8 : i32 to vector<1x128xi32>
    %25 = arith.cmpi ne, %23, %24 : vector<1x128xi32>
    %c1_i32_9 = arith.constant 1 : i32
    %26 = tpu.dynamic_rotate %6 by %c1_i32_9 dim 1 : vector<16x128xf32>, i32 -> vector<16x128xf32>
    %cst_10 = arith.constant 0.000000e+00 : f32
    %27 = vector.shape_cast %25 : vector<1x128xi1> to vector<1x128xi1>
    %28 = vector.broadcast %27 : vector<1x128xi1> to vector<16x128xi1>
    %29 = vector.broadcast %cst_10 : f32 to vector<16x128xf32>
    %30 = arith.select %28, %26, %29 : vector<16x128xi1>, vector<16x128xf32>
    %c64_i32_11 = arith.constant 64 : i32
    %c0_i32_12 = arith.constant 0 : i32
    %31 = arith.cmpi eq, %c64_i32_11, %c0_i32_12 : i32
    %c1_i32_13 = arith.constant 1 : i32
    %32 = arith.select %31, %c1_i32_13, %c64_i32_11 : i32
    %33 = vector.broadcast %32 : i32 to vector<1x128xi32>
    %34 = arith.remsi %7, %33 : vector<1x128xi32>
    %c0_i32_14 = arith.constant 0 : i32
    %35 = vector.broadcast %c0_i32_14 : i32 to vector<1x128xi32>
    %36 = arith.cmpi ne, %34, %35 : vector<1x128xi32>
    %c0_i32_15 = arith.constant 0 : i32
    %37 = vector.broadcast %c0_i32_15 : i32 to vector<1x128xi32>
    %38 = arith.cmpi slt, %34, %37 : vector<1x128xi32>
    %c0_i32_16 = arith.constant 0 : i32
    %39 = arith.cmpi slt, %32, %c0_i32_16 : i32
    %40 = vector.broadcast %39 : i1 to vector<1x128xi1>
    %41 = vector.broadcast %40 : vector<1x128xi1> to vector<1x128xi1>
    %42 = arith.xori %38, %41 : vector<1x128xi1>
    %43 = arith.andi %42, %36 : vector<1x128xi1>
    %44 = vector.broadcast %32 : i32 to vector<1x128xi32>
    %45 = arith.addi %34, %44 : vector<1x128xi32>
    %46 = arith.select %43, %45, %34 : vector<1x128xi1>, vector<1x128xi32>
    %c63_i32 = arith.constant 63 : i32
    %47 = vector.broadcast %c63_i32 : i32 to vector<1x128xi32>
    %48 = arith.cmpi ne, %46, %47 : vector<1x128xi32>
    %c127_i32 = arith.constant 127 : i32
    %49 = tpu.dynamic_rotate %6 by %c127_i32 dim 1 : vector<16x128xf32>, i32 -> vector<16x128xf32>
    %cst_17 = arith.constant 0.000000e+00 : f32
    %50 = vector.shape_cast %48 : vector<1x128xi1> to vector<1x128xi1>
    %51 = vector.broadcast %50 : vector<1x128xi1> to vector<16x128xi1>
    %52 = vector.broadcast %cst_17 : f32 to vector<16x128xf32>
    %53 = arith.select %51, %49, %52 : vector<16x128xi1>, vector<16x128xf32>
    %54 = arith.addf %6, %30 : vector<16x128xf32>
    %55 = arith.addf %54, %53 : vector<16x128xf32>
    %cst_18 = arith.constant 0.333333343 : f32
    %56 = vector.broadcast %cst_18 : f32 to vector<16x128xf32>
    %57 = arith.mulf %55, %56 : vector<16x128xf32>
    %c0_19 = arith.constant 0 : index
    %c0_20 = arith.constant 0 : index
    %58 = vector.load %arg8[%c0_19, %c0_20] : memref<16x16xf32, #tpu.memory_space<vmem>>, vector<16x16xf32>
    %cst_21 = arith.constant dense<0.000000e+00> : vector<16x128xf32>
    %59 = tpu.matmul %58, %57, %cst_21 {dimension_numbers = #tpu.dot_dimension_numbers<[1], [0], [0], [1], [0, 0, 1, 1], [], []>} : vector<16x16xf32>, vector<16x128xf32>, vector<16x128xf32> -> vector<16x128xf32>
    %c0_22 = arith.constant 0 : index
    %c0_23 = arith.constant 0 : index
    %60 = vector.load %arg9[%c0_22, %c0_23] : memref<16x1xf32, #tpu.memory_space<vmem>>, vector<16x1xf32>
    %61 = vector.broadcast %60 : vector<16x1xf32> to vector<16x128xf32>
    %62 = arith.addf %59, %61 : vector<16x128xf32>
    %63 = vector.extract_strided_slice %5 {offsets = [16, 0], sizes = [16, 128], strides = [1, 1]} : vector<48x128xf32> to vector<16x128xf32>
    %c0_24 = arith.constant 0 : index
    %c0_25 = arith.constant 0 : index
    %c0_26 = arith.constant 0 : index
    %64 = vector.load %arg1[%c0_24, %c0_25, %c0_26] : memref<2x128x32xf32, #tpu.memory_space<vmem>>, vector<1x128x32xf32>
    %65 = vector.shape_cast %64 : vector<1x128x32xf32> to vector<128x32xf32>
    %cst_27 = arith.constant dense<0.000000e+00> : vector<16x32xf32>
    %66 = tpu.matmul %63, %65, %cst_27 {dimension_numbers = #tpu.dot_dimension_numbers<[1], [0], [0], [1], [0, 0, 1, 1], [], []>} : vector<16x128xf32>, vector<128x32xf32>, vector<16x32xf32> -> vector<16x32xf32>
    %c0_28 = arith.constant 0 : index
    %c0_29 = arith.constant 0 : index
    %67 = vector.load %arg12[%c0_28, %c0_29] : memref<32x32xf32, #tpu.memory_space<vmem>>, vector<16x32xf32>
    tpu.vector_store %arg12[%c0_28, %c0_29], %66 {strides = array<i32>} : memref<32x32xf32, #tpu.memory_space<vmem>>, vector<16x32xf32>,
    %68 = vector.extract_strided_slice %5 {offsets = [32, 0], sizes = [16, 128], strides = [1, 1]} : vector<48x128xf32> to vector<16x128xf32>
    %c1 = arith.constant 1 : index
    %c0_30 = arith.constant 0 : index
    %c0_31 = arith.constant 0 : index
    %69 = vector.load %arg1[%c1, %c0_30, %c0_31] : memref<2x128x32xf32, #tpu.memory_space<vmem>>, vector<1x128x32xf32>
    %70 = vector.shape_cast %69 : vector<1x128x32xf32> to vector<128x32xf32>
    %cst_32 = arith.constant dense<0.000000e+00> : vector<16x32xf32>
    %71 = tpu.matmul %68, %70, %cst_32 {dimension_numbers = #tpu.dot_dimension_numbers<[1], [0], [0], [1], [0, 0, 1, 1], [], []>} : vector<16x128xf32>, vector<128x32xf32>, vector<16x32xf32> -> vector<16x32xf32>
    %c16 = arith.constant 16 : index
    %c0_33 = arith.constant 0 : index
    %72 = vector.load %arg12[%c16, %c0_33] : memref<32x32xf32, #tpu.memory_space<vmem>>, vector<16x32xf32>
    tpu.vector_store %arg12[%c16, %c0_33], %71 {strides = array<i32>} : memref<32x32xf32, #tpu.memory_space<vmem>>, vector<16x32xf32>,
    %c0_34 = arith.constant 0 : index
    %c0_35 = arith.constant 0 : index
    %73 = vector.load %arg4[%c0_34, %c0_35] : memref<16x32xf32, #tpu.memory_space<vmem>>, vector<16x32xf32>
    %c0_36 = arith.constant 0 : index
    %c0_37 = arith.constant 0 : index
    %74 = vector.load %arg12[%c0_36, %c0_37] : memref<32x32xf32, #tpu.memory_space<vmem>>, vector<32x32xf32>
    %cst_38 = arith.constant dense<0.000000e+00> : vector<16x32xf32>
    %75 = tpu.matmul %73, %74, %cst_38 {dimension_numbers = #tpu.dot_dimension_numbers<[1], [0], [0], [1], [0, 0, 1, 1], [], []>} : vector<16x32xf32>, vector<32x32xf32>, vector<16x32xf32> -> vector<16x32xf32>
    %c0_39 = arith.constant 0 : index
    %c0_40 = arith.constant 0 : index
    %76 = vector.load %arg5[%c0_39, %c0_40] : memref<16x1xf32, #tpu.memory_space<vmem>>, vector<16x1xf32>
    %77 = vector.broadcast %76 : vector<16x1xf32> to vector<16x32xf32>
    %78 = arith.addf %75, %77 : vector<16x32xf32>
    %79 = tpu.transpose %78, [1, 0] : vector<16x32xf32> -> vector<32x16xf32>
    %c0_41 = arith.constant 0 : index
    %c0_42 = arith.constant 0 : index
    %c0_43 = arith.constant 0 : index
    %80 = vector.load %arg7[%c0_41, %c0_42, %c0_43] : memref<2x1x16xf32, #tpu.memory_space<vmem>>, vector<1x1x16xf32>
    %81 = vector.shape_cast %80 : vector<1x1x16xf32> to vector<1x16xf32>
    %82 = vector.broadcast %81 : vector<1x16xf32> to vector<32x16xf32>
    %83 = arith.mulf %79, %82 : vector<32x16xf32>
    %c1_44 = arith.constant 1 : index
    %c0_45 = arith.constant 0 : index
    %c0_46 = arith.constant 0 : index
    %84 = vector.load %arg7[%c1_44, %c0_45, %c0_46] : memref<2x1x16xf32, #tpu.memory_space<vmem>>, vector<1x1x16xf32>
    %85 = vector.shape_cast %84 : vector<1x1x16xf32> to vector<1x16xf32>
    %86 = vector.broadcast %85 : vector<1x16xf32> to vector<32x16xf32>
    %87 = arith.mulf %79, %86 : vector<32x16xf32>
    %88 = tpu.concatenate %83, %87 in 0 : vector<32x16xf32>, vector<32x16xf32> -> vector<64x16xf32>
    %cst_47 = arith.constant dense<0.000000e+00> : vector<64x128xf32>
    %89 = tpu.matmul %88, %6, %cst_47 {dimension_numbers = #tpu.dot_dimension_numbers<[1], [0], [0], [1], [0, 0, 1, 1], [], []>} : vector<64x16xf32>, vector<16x128xf32>, vector<64x128xf32> -> vector<64x128xf32>
    %90 = vector.shape_cast %89 : vector<64x128xf32> to vector<4x16x128xf32>
    %cst_48 = arith.constant dense<0xFF800000> : vector<4x128xf32>
    %91 = vector.multi_reduction <maximumf>, %90, %cst_48 [1] : vector<4x16x128xf32> to vector<4x128xf32>
    %92 = vector.shape_cast %91 : vector<4x128xf32> to vector<4x1x128xf32>
    %93 = vector.broadcast %92 : vector<4x1x128xf32> to vector<4x16x128xf32>
    %94 = arith.subf %90, %93 : vector<4x16x128xf32>
    %95 = math.exp %94 : vector<4x16x128xf32>
    %cst_49 = arith.constant dense<0.000000e+00> : vector<4x128xf32>
    %96 = vector.multi_reduction <add>, %95, %cst_49 [1] : vector<4x16x128xf32> to vector<4x128xf32>
    %97 = vector.shape_cast %96 : vector<4x128xf32> to vector<4x1x128xf32>
    %98 = tpu.reciprocal %97 : vector<4x1x128xf32> -> vector<4x1x128xf32>
    %99 = vector.broadcast %98 : vector<4x1x128xf32> to vector<4x16x128xf32>
    %100 = arith.mulf %95, %99 : vector<4x16x128xf32>
    %101 = vector.shape_cast %100 : vector<4x16x128xf32> to vector<64x128xf32>
    %c0_50 = arith.constant 0 : index
    %c0_51 = arith.constant 0 : index
    %102 = vector.load %arg10[%c0_50, %c0_51] : memref<64x128xf32, #tpu.memory_space<vmem>>, vector<64x128xf32>
    %103 = arith.mulf %101, %102 : vector<64x128xf32>
    %c0_52 = arith.constant 0 : index
    %c0_53 = arith.constant 0 : index
    %c0_54 = arith.constant 0 : index
    %104 = vector.load %arg6[%c0_52, %c0_53, %c0_54] : memref<2x16x16xf32, #tpu.memory_space<vmem>>, vector<1x16x16xf32>
    %105 = vector.shape_cast %104 : vector<1x16x16xf32> to vector<16x16xf32>
    %cst_55 = arith.constant dense<0.000000e+00> : vector<16x32xf32>
    %106 = tpu.matmul %105, %66, %cst_55 {dimension_numbers = #tpu.dot_dimension_numbers<[1], [0], [0], [1], [0, 0, 1, 1], [], []>} : vector<16x16xf32>, vector<16x32xf32>, vector<16x32xf32> -> vector<16x32xf32>
    %c1_56 = arith.constant 1 : index
    %c0_57 = arith.constant 0 : index
    %c0_58 = arith.constant 0 : index
    %107 = vector.load %arg6[%c1_56, %c0_57, %c0_58] : memref<2x16x16xf32, #tpu.memory_space<vmem>>, vector<1x16x16xf32>
    %108 = vector.shape_cast %107 : vector<1x16x16xf32> to vector<16x16xf32>
    %cst_59 = arith.constant dense<0.000000e+00> : vector<16x32xf32>
    %109 = tpu.matmul %108, %71, %cst_59 {dimension_numbers = #tpu.dot_dimension_numbers<[1], [0], [0], [1], [0, 0, 1, 1], [], []>} : vector<16x16xf32>, vector<16x32xf32>, vector<16x32xf32> -> vector<16x32xf32>
    %110 = tpu.concatenate %106, %109 in 1 : vector<16x32xf32>, vector<16x32xf32> -> vector<16x64xf32>
    %cst_60 = arith.constant dense<0.000000e+00> : vector<16x128xf32>
    %111 = tpu.matmul %110, %103, %cst_60 {dimension_numbers = #tpu.dot_dimension_numbers<[1], [0], [0], [1], [0, 0, 1, 1], [], []>} : vector<16x64xf32>, vector<64x128xf32>, vector<16x128xf32> -> vector<16x128xf32>
    %112 = arith.addf %62, %111 : vector<16x128xf32>
    %c0_61 = arith.constant 0 : index
    %c0_62 = arith.constant 0 : index
    %113 = vector.load %arg11[%c0_61, %c0_62] : memref<16x128xf32, #tpu.memory_space<vmem>>, vector<16x128xf32>
    tpu.vector_store %arg11[%c0_61, %c0_62], %112 {strides = array<i32>} : memref<16x128xf32, #tpu.memory_space<vmem>>, vector<16x128xf32>,
    return
  }
}

</mosaic_0001>

<bundles_post_ra>
// kernel: tpu_custom_call.1
= control target key start
LH: loop header
LB: loop body
LE: loop exit
PB: predicated region body
PF: predicated region fallthrough
CT: control target
= control target key end

     0   :  { %vm83_vm0 = vcmask 130048   ;;  %v1521_v5 = vmov 0   ;;  %s1867_s0 = inlined_call_operand.vmem [shape: f32[16,128], index: 0, kind: input, shape index: {}]   ;;  %s1868_s1 = inlined_call_operand.vmem [shape: f32[2,128,32], index: 1, kind: input, shape index: {}]   ;;  %s1869_s2 = inlined_call_operand.vmem [shape: f32[48,16], index: 2, kind: input, shape index: {}]   ;;  %s1870_s3 = inlined_call_operand.vmem [shape: f32[48,1], index: 3, kind: input, shape index: {}]   ;;  %s1871_s4 = inlined_call_operand.vmem [shape: f32[16,32], index: 4, kind: input, shape index: {}]   ;;  %s1872_s5 = inlined_call_operand.vmem [shape: f32[16,1], index: 5, kind: input, shape index: {}]   ;;  %s1873_s6 = inlined_call_operand.vmem [shape: f32[2,16,16], index: 6, kind: input, shape index: {}]   ;;  %s1874_s7 = inlined_call_operand.vmem [shape: f32[2,1,16], index: 7, kind: input, shape index: {}]   ;;  %s1875_s8 = inlined_call_operand.vmem [shape: f32[16,16], index: 8, kind: input, shape index: {}]   ;;  %s1876_s9 = inlined_call_operand.vmem [shape: f32[16,1], index: 9, kind: input, shape index: {}]   ;;  %s1877_s10 = inlined_call_operand.vmem [shape: f32[64,128], index: 10, kind: input, shape index: {}]   ;;  %s1878_s11 = inlined_call_operand.hbm [shape: f32[16,128], index: 11, kind: output, shape index: {}]  }
   0x1   :  { %v40_v0 = vld [vmem:[%s1867_s0 + $0x8] sm:$0xff]  ;;  %v39_v1 = vld [vmem:[%s1867_s0] sm:$0xff]  ;;  %1473 = vset.pattern.permute.xlu0 %v1521_v5  ;;  %v43_v6 = vld [vmem:[%s1869_s2 + $0x10] sm:$0xff] }
   0x2   :  { %v41_v2 = vld [vmem:[%s1869_s2] sm:$0xff]  ;;  %1315 = vmatprep.subr.mxu0 %v40_v0  ;;  %v48_v3 = vld [vmem:[%s1870_s3 + $0x8] sm:$0xff] }
   0x3   :  { %1319 = vmatprep.mubr.msk.f32.mxu0 %vm83_vm0, %v41_v2  ;;  %1316 = vmatpush3.msra.mxu0 %v40_v0  ;;  %v42_v4 = vld [vmem:[%s1869_s2 + $0x8] sm:$0xff] }
   0x4   :  { %1317 = vmatprep.subr.mxu0 %v39_v1  ;;  %60 = vperm.xlu0 %1473, %v48_v3  }
   0x5   :  { %16 = vsyncpa [#allocation4], 0  ;;  %1318 = vmatpush3.msra.mxu0 %v39_v1  ;;  %v47_v7 = vld [vmem:[%s1870_s3] sm:$0xff]  ;;  %1474 = vset.pattern.permute.xlu1 %v1521_v5  ;;  %v44_v8 = vld [vmem:[%s1869_s2 + $0x18] sm:$0xff]  ;;  %s1522_s24 = smov 127   ;;  %s1523_s25 = smov 1   ;;  %v197_v40 = vlaneseq }
   0x6   :  { %1320 = vmatmul.mubr.msk.f32.vlgmr.msra.gmra.mxu0 %vm83_vm0, %v42_v4  ;;  %v45_v9 = vld [vmem:[%s1869_s2 + $0x20] sm:$0xff]  ;;  %v46_v10 = vld [vmem:[%s1869_s2 + $0x28] sm:$0xff]  ;;  %v345_v11 = vld [vmem:[%s1868_s1 + $0x78] sm:$0xff]  ;;  %vm421_vm3 = vcmask 261120   ;;  %s1524_s18 = smov 32   ;;  %vm1086_vm4 = vcmask 523264  }
   0x7   :  { %1322 = vmatprep.mubr.msk.f32.mxu0 %vm83_vm0, %v43_v6  ;;  %1335 = vmatprep.subr.mxu0 %v345_v11  ;;  %v344_v12 = vld [vmem:[%s1868_s1 + $0x70] sm:$0xff]  ;;  %v343_v14 = vld [vmem:[%s1868_s1 + $0x68] sm:$0xff]  ;;  %v342_v17 = vld [vmem:[%s1868_s1 + $0x60] sm:$0xff]  ;;  %v198_v41 = vand.u32 127, %v197_v40  ;;  %s1525_s15 = smov [#allocation3]  }
   0x8   :  { %55 = vperm.xlu0 %1473, %v47_v7   ;;  %1336 = vmatpush3.msra.mxu0 %v345_v11  ;;  %v235_v19 = vld [vmem:[%s1875_s8] sm:$0xff]  ;;  %v341_v20 = vld [vmem:[%s1868_s1 + $0x58] sm:$0xff]  ;;  %v340_v24 = vld [vmem:[%s1868_s1 + $0x50] sm:$0xff] }
   0x9   :  { %1337 = vmatprep.subr.mxu0 %v344_v12  ;;  %v51_v22 = vld [vmem:[%s1870_s3 + $0x20] sm:$0xff]  ;;  %1332 = vmatprep.mubr.msk.f32.mxu1 %vm83_vm0, %v235_v19  ;;  %v339_v25 = vld [vmem:[%s1868_s1 + $0x48] sm:$0xff]  ;;  %v49_v26 = vld [vmem:[%s1870_s3 + $0x10] sm:$0xff]  ;;  %v203_v42 = vand.u32 63, %v198_v41 }
   0xa   :  { %1323 = vmatmul.mubr.msk.f32.gmra.mxu0 %vm83_vm0, %v44_v8  ;;  %v338_v27 = vld [vmem:[%s1868_s1 + $0x40] sm:$0xff]  ;;  %v52_v29 = vld [vmem:[%s1870_s3 + $0x28] sm:$0xff]  ;;  %v337_v30 = vld [vmem:[%s1868_s1 + $0x38] sm:$0xff] }
   0xb   :  { %1325 = vmatprep.mubr.msk.f32.mxu0 %vm83_vm0, %v45_v9  ;;  %1338 = vmatpush3.msra.mxu0 %v344_v12  ;;  %v524_v28 = vld [vmem:[%s1872_s5] sm:$0xff]  ;;  %v336_v31 = vld [vmem:[%s1868_s1 + $0x30] sm:$0xff]  ;;  %v50_v32 = vld [vmem:[%s1870_s3 + $0x18] sm:$0xff]  ;;  %vm211_vm1 = vcmp.ne.s32.totalorder %v203_v42, 0  ;;  %vm1702_vm2 = vcmp.ne.s32.totalorder %v203_v42, 63 }
   0xc   :  { %1339 = vmatprep.subr.mxu0 %v343_v14  ;;  %v335_v33 = vld [vmem:[%s1868_s1 + $0x28] sm:$0xff]  ;;  %v334_v34 = vld [vmem:[%s1868_s1 + $0x20] sm:$0xff]  ;;  %v333_v36 = vld [vmem:[%s1868_s1 + $0x18] sm:$0xff] }
   0xd   :  { %1340 = vmatpush3.msra.mxu0 %v343_v14  ;;  %v525_v35 = vld [vmem:[%s1872_s5 + $0x8] sm:$0xff]  ;;  %v332_v37 = vld [vmem:[%s1868_s1 + $0x10] sm:$0xff]  ;;  %v330_v39 = vld [vmem:[%s1868_s1] sm:$0xff] }
   0xe   :  { %1326 = vmatmul.mubr.msk.f32.gmra.mxu0 %vm83_vm0, %v46_v10  ;;  %1341 = vmatprep.subr.mxu0 %v342_v17  ;;  %v331_v38 = vld [vmem:[%s1868_s1 + $0x8] sm:$0xff]  ;;  %v1211_v0 = vld [vmem:[%s1868_s1 + $0xf8] sm:$0xff]  ;;  %v1210_v2 = vld [vmem:[%s1868_s1 + $0xf0] sm:$0xff] }
   0xf   :  { %1342 = vmatpush3.msra.mxu0 %v342_v17  ;;  %v236_v63 = vld [vmem:[%s1875_s8 + $0x8] sm:$0xff]  ;;  %v1208_v6 = vld [vmem:[%s1868_s1 + $0xe0] sm:$0xff]  ;;  %v1207_v7 = vld [vmem:[%s1868_s1 + $0xd8] sm:$0xff] }
  0x10   :  { %1343 = vmatprep.subr.mxu0 %v341_v20  ;;  %v1209_v4 = vld [vmem:[%s1868_s1 + $0xe8] sm:$0xff]  ;;  %v1206_v9 = vld [vmem:[%s1868_s1 + $0xd0] sm:$0xff]  ;;  %v1203_v14 = vld [vmem:[%s1868_s1 + $0xb8] sm:$0xff] }
  0x11   :  { %1344 = vmatpush3.msra.mxu0 %v341_v20  ;;  %v1205_v10 = vld [vmem:[%s1868_s1 + $0xc8] sm:$0xff]  ;;  %v1199_v19 = vld [vmem:[%s1868_s1 + $0x98] sm:$0xff]  ;;  %v1198_v20 = vld [vmem:[%s1868_s1 + $0x90] sm:$0xff] }
  0x12   :  { %1345 = vmatprep.subr.mxu0 %v340_v24  ;;  %v1201_v17 = vld [vmem:[%s1868_s1 + $0xa8] sm:$0xff] }
  0x13   :  { %1346 = vmatpush3.msra.mxu0 %v340_v24 }
  0x14   :  { %1347 = vmatprep.subr.mxu0 %v339_v25 }
  0x15   :  { %1348 = vmatpush3.msra.mxu0 %v339_v25  ;;  %v518_v25 = vld [vmem:[%s1871_s4] sm:$0xff] }
  0x16   :  { %1349 = vmatprep.subr.mxu0 %v338_v27 }
  0x17   :  { %1350 = vmatpush3.msra.mxu0 %v338_v27 }
  0x18   :  { %1351 = vmatprep.subr.mxu0 %v337_v30 }
  0x19   :  { %1352 = vmatpush3.msra.mxu0 %v337_v30 }
  0x1a   :  { %1353 = vmatprep.subr.mxu0 %v336_v31 }
  0x1b   :  { %1354 = vmatpush3.msra.mxu0 %v336_v31 }
  0x1c   :  { %1355 = vmatprep.subr.mxu0 %v335_v33 }
  0x1d   :  { %1356 = vmatpush3.msra.mxu0 %v335_v33 }
  0x1e   :  { %1357 = vmatprep.subr.mxu0 %v334_v34 }
  0x1f   :  { %1358 = vmatpush3.msra.mxu0 %v334_v34  ;;  %v519_v34 = vld [vmem:[%s1871_s4 + $0x8] sm:$0xff] }
  0x20   :  { %1359 = vmatprep.subr.mxu0 %v333_v36 }
  0x21   :  { %1360 = vmatpush3.msra.mxu0 %v333_v36  ;;  %v910_v36 = vld [vmem:[%s1873_s6 + $0x8] sm:$0xff] }
  0x22   :  { %1361 = vmatprep.subr.mxu0 %v332_v37 }
  0x23   :  { %1362 = vmatpush3.msra.mxu0 %v332_v37  ;;  %v1227_v37 = vld [vmem:[%s1873_s6 + $0x10] sm:$0xff] }
  0x24   :  { %1363 = vmatprep.subr.mxu0 %v331_v38 }
  0x25   :  { %1364 = vmatpush3.msra.mxu0 %v331_v38  ;;  %v1228_v38 = vld [vmem:[%s1873_s6 + $0x18] sm:$0xff] }
  0x26   :  { %1365 = vmatprep.subr.mxu0 %v330_v39 }
  0x27   :  { %1366 = vmatpush3.msra.mxu0 %v330_v39 }
  0x7f   :  { %v61_v13 = vpop.permute.xlu0 %60 }
  0x83   :  { %v56_v21 = vpop.permute.xlu0 %55 }
  0xc6   :  { %v1321_v15 = vpop.f32.mrf.mxu0 }
  0xc7   :  { %v1633_v16 = vadd.f32 %v1321_v15, %v61_v13  ;;  %v1204_v13 = vld [vmem:[%s1868_s1 + $0xc0] sm:$0xff]  ;;  %v1202_v15 = vld [vmem:[%s1868_s1 + $0xb0] sm:$0xff] }
  0xc8   :  { %v168_v18 = vpop.f32.mrf.mxu0 }
  0xc9   :  { %223 = vrot.lane.b32.xlu0 %v1633_v16, %s1522_s24  ;;  %214 = vrot.lane.b32.xlu1 %v1633_v16, %s1523_s25  ;;  %v1650_v23 = vadd.f32 %v168_v18, %v56_v21  ;;  %v1200_v18 = vld [vmem:[%s1868_s1 + $0xa0] sm:$0xff]  ;;  %v1197_v21 = vld [vmem:[%s1868_s1 + $0x88] sm:$0xff] }
  0xca   :  { %v1324_v43 = vpop.f32.mrf.mxu0 }
  0xcc   :  { %v178_v50 = vpop.f32.mrf.mxu0 }
  0xcd   :  { %75 = vperm.xlu0 %1473, %v51_v22   ;;  %212 = vrot.lane.b32.xlu1 %v1650_v23, %s1523_s25  ;;  %v1196_v22 = vld [vmem:[%s1868_s1 + $0x80] sm:$0xff] }
  0xce   :  { %v1709_v55 = vpop.f32.mrf.mxu0 }
  0xd0   :  { %v188_v60 = vpop.f32.mrf.mxu0 }
  0xd1   :  { %65 = vperm.xlu0 %1473, %v49_v26   ;;  %221 = vrot.lane.b32.xlu1 %v1650_v23, %s1522_s24 }
  0xd5   :  { %528 = vperm.xlu0 %1473, %v524_v28   ;;  %80 = vperm.xlu1 %1474, %v52_v29  }
  0xd9   :  { %70 = vperm.xlu1 %1474, %v50_v32  }
  0xdd   :  { %533 = vperm.xlu1 %1474, %v525_v35   ;;  %v909_v35 = vld [vmem:[%s1873_s6] sm:$0xff] }
 0x13b   :  { %v224_v45 = vpop.permute.xlu0 %223  ;;  %v215_v46 = vpop.permute.xlu1 %214 }
 0x13c   :  { %v219_v47 = vsel %vm211_vm1, %v215_v46, 0.0  ;;  %v228_v49 = vsel %vm1702_vm2, %v224_v45, 0.0 }
 0x13d   :  { %v230_v48 = vadd.f32 %v219_v47, %v1633_v16 }
 0x13f   :  { %v213_v51 = vpop.permute.xlu1 %212  ;;  %v232_v52 = vadd.f32 %v230_v48, %v228_v49  ;;  %v237_v49 = vld [vmem:[%s1876_s9] sm:$0xff] }
 0x140   :  { %v218_v53 = vsel %vm211_vm1, %v213_v51, 0.0  ;;  %v1214_v51 = vld [vmem:[%s1874_s7] ss:$0 sm:$0xff] }
 0x141   :  { %v234_v54 = vmul.f32 0.33333334, %v232_v52  ;;  %v229_v56 = vadd.f32 %v218_v53, %v1650_v23 }
 0x143   :  { %1328 = vmatprep.subr.mxu1 %v234_v54  ;;  %v222_v57 = vpop.permute.xlu1 %221 }
 0x144   :  { %v227_v58 = vsel %vm1702_vm2, %v222_v57, 0.0  ;;  %1329 = vmatpush3.msra.mxu1 %v234_v54 }
 0x145   :  { %v231_v59 = vadd.f32 %v229_v56, %v227_v58  ;;  %v1216_v58 = vld [vmem:[%s1874_s7 + $0x1] ss:$0 sm:$0xff] }
 0x147   :  { %v233_v61 = vmul.f32 0.33333334, %v231_v59 }
 0x148   :  { %v76_v62 = vpop.permute.xlu0 %75 }
 0x149   :  { %v189_v1 = vadd.f32 %v188_v60, %v76_v62  ;;  %1330 = vmatprep.subr.mxu1 %v233_v61 }
 0x14a   :  { %1331 = vmatpush3.msra.mxu1 %v233_v61 }
 0x14b   :  { %1333 = vmatmul.mubr.msk.f32.vlgmr.msra.gmra.mxu1 %vm83_vm0, %v236_v63  ;;  %1370 = vmatprep.subr.mxu1 %v1211_v0 }
 0x14c   :  { %v66_v3 = vpop.permute.xlu0 %65  ;;  %1371 = vmatpush3.msra.mxu1 %v1211_v0  ;;  %1402 = vmatprep.mubr.f32.mxu1 %v189_v1 }
 0x14d   :  { %v179_v5 = vadd.f32 %v178_v50, %v66_v3  ;;  %1372 = vmatprep.subr.mxu1 %v1210_v2  ;;  %v238_v50 = vld [vmem:[%s1876_s9 + $0x8] sm:$0xff] }
 0x14e   :  { %1373 = vmatpush3.msra.mxu1 %v1210_v2 }
 0x14f   :  { %1367 = vmatprep.mubr.f32.mxu0 %v179_v5  ;;  %1374 = vmatprep.subr.mxu1 %v1209_v4 }
 0x150   :  { %1375 = vmatpush3.msra.mxu1 %v1209_v4  ;;  %v81_v8 = vpop.permute.xlu1 %80  ;;  %v529_v40 = vpop.permute.xlu0 %528 }
 0x151   :  { %1376 = vmatprep.subr.mxu1 %v1208_v6  ;;  %v194_v24 = vadd.f32 %v1709_v55, %v81_v8 }
 0x152   :  { %1377 = vmatpush3.msra.mxu1 %v1208_v6 }
 0x153   :  { %1378 = vmatprep.subr.mxu1 %v1207_v7 }
 0x154   :  { %1379 = vmatpush3.msra.mxu1 %v1207_v7  ;;  %v71_v11 = vpop.permute.xlu1 %70 }
 0x155   :  { %1380 = vmatprep.subr.mxu1 %v1206_v9  ;;  %v184_v12 = vadd.f32 %v1324_v43, %v71_v11 }
 0x156   :  { %1381 = vmatpush3.msra.mxu1 %v1206_v9 }
 0x157   :  { %1382 = vmatprep.subr.mxu1 %v1205_v10  ;;  %1368 = vmatmul.mubr.f32.vlgmr.msra.gmra.mxu0 %v184_v12 }
 0x158   :  { %1383 = vmatpush3.msra.mxu1 %v1205_v10  ;;  %1413 = vmatprep.mubr.msk.f32.mxu0 %vm421_vm3, %v518_v25  ;;  %v534_v44 = vpop.permute.xlu1 %533 }
 0x159   :  { %1384 = vmatprep.subr.mxu1 %v1204_v13 }
 0x15a   :  { %1385 = vmatpush3.msra.mxu1 %v1204_v13 }
 0x15b   :  { %1386 = vmatprep.subr.mxu1 %v1203_v14 }
 0x15c   :  { %1387 = vmatpush3.msra.mxu1 %v1203_v14 }
 0x15d   :  { %1388 = vmatprep.subr.mxu1 %v1202_v15 }
 0x15e   :  { %1389 = vmatpush3.msra.mxu1 %v1202_v15 }
 0x15f   :  { %1390 = vmatprep.subr.mxu1 %v1201_v17 }
 0x160   :  { %1391 = vmatpush3.msra.mxu1 %v1201_v17 }
 0x161   :  { %1392 = vmatprep.subr.mxu1 %v1200_v18 }
 0x162   :  { %1393 = vmatpush3.msra.mxu1 %v1200_v18 }
 0x163   :  { %1394 = vmatprep.subr.mxu1 %v1199_v19 }
 0x164   :  { %1395 = vmatpush3.msra.mxu1 %v1199_v19 }
 0x165   :  { %1396 = vmatprep.subr.mxu1 %v1198_v20 }
 0x166   :  { %1397 = vmatpush3.msra.mxu1 %v1198_v20 }
 0x167   :  { %1398 = vmatprep.subr.mxu1 %v1197_v21 }
 0x168   :  { %1399 = vmatpush3.msra.mxu1 %v1197_v21 }
 0x169   :  { %1400 = vmatprep.subr.mxu1 %v1196_v22 }
 0x16a   :  { %1401 = vmatpush3.msra.mxu1 %v1196_v22 }
 0x16b   :  { %1403 = vmatmul.mubr.f32.vlgmr.msra.gmra.mxu1 %v194_v24  ;;  %1416 = vmatprep.subr.mxu1 %v1633_v16 }
 0x16c   :  { %1417 = vmatpush3.msra.mxu1 %v1633_v16 }
 0x16d   :  { %1418 = vmatprep.subr.mxu1 %v1650_v23 }
 0x16e   :  { %1419 = vmatpush3.msra.mxu1 %v1650_v23 }
 0x20b   :  { %v1777_v28 = vpop.f32.mrf.mxu1 }
 0x20d   :  { %v1779_v16 = vpop.f32.mrf.mxu1 }
 0x217   :  { %v1369_v26 = vpop.f32.mrf.mxu0 }
 0x218   :  { %423 = vst.msk [vmem:[#allocation2 + $0x8] sm:$0xff] %vm421_vm3, %v1369_v26 }
 0x219   :  { %v412_v27 = vpop.f32.mrf.mxu0 }
 0x21a   :  { %422 = vst.msk [vmem:[#allocation2] sm:$0xff] %vm421_vm3, %v412_v27 }
 0x21f   :  { %v521_v32 = vld [vmem:[#allocation2 + $0x8] sm:$0xff] }
 0x221   :  { %v520_v33 = vld [vmem:[#allocation2] sm:$0xff] }
 0x22b   :  { %v1404_v29 = vpop.f32.mrf.mxu1 }
 0x22c   :  { %517 = vst.msk [vmem:[#allocation2 + $0x18] sm:$0xff] %vm421_vm3, %v1404_v29 }
 0x22d   :  { %v507_v23 = vpop.f32.mrf.mxu1 }
 0x22e   :  { %516 = vst.msk [vmem:[#allocation2 + $0x10] sm:$0xff] %vm421_vm3, %v507_v23 }
 0x233   :  { %v523_v30 = vld [vmem:[#allocation2 + $0x18] sm:$0xff] }
 0x234   :  { %1405 = vmatprep.subr.mxu0 %v523_v30 }
 0x235   :  { %1406 = vmatpush3.msra.mxu0 %v523_v30  ;;  %v522_v31 = vld [vmem:[#allocation2 + $0x10] sm:$0xff] }
 0x236   :  { %1407 = vmatprep.subr.mxu0 %v522_v31 }
 0x237   :  { %1408 = vmatpush3.msra.mxu0 %v522_v31 }
 0x238   :  { %1409 = vmatprep.subr.mxu0 %v521_v32 }
 0x239   :  { %1410 = vmatpush3.msra.mxu0 %v521_v32 }
 0x23a   :  { %1411 = vmatprep.subr.mxu0 %v520_v33 }
 0x23b   :  { %1412 = vmatpush3.msra.mxu0 %v520_v33 }
 0x23c   :  { %1414 = vmatmul.mubr.msk.f32.vlgmr.msra.gmra.mxu0 %vm421_vm3, %v519_v34  ;;  %1432 = vmatprep.subr.mxu0 %v1369_v26 }
 0x23d   :  { %1433 = vmatpush3.msra.mxu0 %v1369_v26  ;;  %1436 = vmatprep.mubr.msk.f32.mxu0 %vm83_vm0, %v909_v35 }
 0x23e   :  { %1434 = vmatprep.subr.mxu0 %v412_v27 }
 0x23f   :  { %1435 = vmatpush3.msra.mxu0 %v412_v27 }
 0x240   :  { %1437 = vmatmul.mubr.msk.f32.vlgmr.msra.gmra.mxu0 %vm83_vm0, %v910_v36  ;;  %1439 = vmatprep.subr.mxu0 %v1404_v29 }
 0x241   :  { %1440 = vmatpush3.msra.mxu0 %v1404_v29  ;;  %1443 = vmatprep.mubr.msk.f32.mxu0 %vm83_vm0, %v1227_v37 }
 0x242   :  { %1441 = vmatprep.subr.mxu0 %v507_v23 }
 0x243   :  { %1442 = vmatpush3.msra.mxu0 %v507_v23 }
 0x244   :  { %1444 = vmatmul.mubr.msk.f32.vlgmr.msra.gmra.mxu0 %vm83_vm0, %v1228_v38 }
 0x2fc   :  { %v1415_v39 = vpop.f32.mrf.mxu0 }
 0x2fd   :  { %v614_v46 = vadd.f32 %v1415_v39, %v534_v44 }
 0x2fe   :  { %v608_v41 = vpop.f32.mrf.mxu0 }
 0x2ff   :  { %v609_v42 = vadd.f32 %v608_v41, %v529_v40 }
 0x300   :  { %v1803_v43 = vpop.f32.mrf.mxu0 }
 0x301   :  { %617 = vxpose.xlu0.b32.start [1/2] (short) (narrow) %v609_v42, 32 }
 0x302   :  { %v983_v45 = vpop.f32.mrf.mxu0 }
 0x304   :  { %v1445_v47 = vpop.f32.mrf.mxu0 }
 0x305   :  { %618 = vxpose.xlu0.b32.end [2/2] (short) (narrow) %v614_v46, 32 }
 0x306   :  { %v1067_v48 = vpop.f32.mrf.mxu0 }
 0x307   :  { %1078 = vrot.lane.b32.xlu1 %v1067_v48, %s1524_s18 }
 0x30b   :  { %1080 = vrot.lane.b32.xlu1 %v1445_v47, %s1524_s18 }
 0x30f   :  { %241 = vperm.xlu1 %1474, %v237_v49  }
 0x313   :  { %246 = vperm.xlu1 %1474, %v238_v50  }
 0x379   :  { %v1079_v0 = vpop.permute.xlu1 %1078 }
 0x37a   :  { %v1084_v1 = vsel %vm421_vm3, %v983_v45, %v1079_v0 }
 0x37d   :  { %v633_v52 = vpop.trf.xlu0 }
 0x37e   :  { %v656_v53 = vmul.f32 %v1214_v51, %v633_v52  ;;  %v668_v61 = vmul.f32 %v1216_v58, %v633_v52 }
 0x380   :  { %1420 = vmatprep.mubr.msk.f32.mxu1 %vm83_vm0, %v656_v53 }
 0x381   :  { %v634_v54 = vpop.trf.xlu0 }
 0x382   :  { %v657_v55 = vmul.f32 %v1214_v51, %v634_v54  ;;  %v669_v62 = vmul.f32 %v1216_v58, %v634_v54 }
 0x384   :  { %1421 = vmatmul.mubr.msk.f32.vlgmr.msra.gmra.mxu1 %vm83_vm0, %v657_v55 }
 0x385   :  { %v635_v56 = vpop.trf.xlu0 }
 0x386   :  { %v658_v57 = vmul.f32 %v1214_v51, %v635_v56  ;;  %v670_v63 = vmul.f32 %v1216_v58, %v635_v56 }
 0x388   :  { %1423 = vmatprep.mubr.msk.f32.mxu1 %vm83_vm0, %v658_v57 }
 0x389   :  { %v636_v59 = vpop.trf.xlu0 }
 0x38a   :  { %v659_v60 = vmul.f32 %v1214_v51, %v636_v59  ;;  %v671_v2 = vmul.f32 %v1216_v58, %v636_v59 }
 0x38c   :  { %1424 = vmatmul.mubr.msk.f32.gmra.mxu1 %vm83_vm0, %v659_v60 }
 0x38d   :  { %1426 = vmatprep.mubr.msk.f32.mxu1 %vm83_vm0, %v668_v61 }
 0x390   :  { %1427 = vmatmul.mubr.msk.f32.gmra.mxu1 %vm83_vm0, %v669_v62 }
 0x391   :  { %1429 = vmatprep.mubr.msk.f32.mxu1 %vm83_vm0, %v670_v63 }
 0x394   :  { %1430 = vmatmul.mubr.msk.f32.gmra.mxu1 %vm83_vm0, %v671_v2 }
 0x395   :  { %1462 = vmatprep.mubr.msk.f32.mxu1 %vm1086_vm4, %v1084_v1 }
 0x444   :  { %v1422_v3 = vpop.f32.mrf.mxu1 }
 0x446   :  { %v762_v4 = vpop.f32.mrf.mxu1 }
 0x447   :  { %v801_v5 = vmax.f32 %v762_v4, %v1422_v3 }
 0x449   :  { %v802_v6 = vrot.slane %v801_v5, 4 }
 0x44b   :  { %v803_v7 = vmax.f32 %v801_v5, %v802_v6 }
 0x44c   :  { %v1425_v8 = vpop.f32.mrf.mxu1 }
 0x44d   :  { %v804_v9 = vrot.slane %v803_v7, 2 }
 0x44e   :  { %v772_v10 = vpop.f32.mrf.mxu1 }
 0x44f   :  { %v805_v11 = vmax.f32 %v803_v7, %v804_v9  ;;  %v808_v12 = vmax.f32 %v772_v10, %v1425_v8 }
 0x450   :  { %v1428_v13 = vpop.f32.mrf.mxu1 }
 0x451   :  { %v806_v14 = vrot.slane %v805_v11, 1  ;;  %v809_v15 = vrot.slane %v808_v12, 4 }
 0x452   :  { %v782_v17 = vpop.f32.mrf.mxu1 }
 0x453   :  { %v810_v18 = vmax.f32 %v808_v12, %v809_v15  ;;  %v815_v19 = vmax.f32 %v782_v17, %v1428_v13  ;;  %v807_v20 = vmax.f32 %v805_v11, %v806_v14 }
 0x454   :  { %v1431_v21 = vpop.f32.mrf.mxu1 }
 0x455   :  { %v811_v22 = vrot.slane %v810_v18, 2  ;;  %v816_v24 = vrot.slane %v815_v19, 4  ;;  %v829_v29 = vsub.f32 %v762_v4, %v807_v20  ;;  %v830_v33 = vsub.f32 %v1422_v3, %v807_v20 }
 0x456   :  { %v792_v25 = vpop.f32.mrf.mxu1 }
 0x457   :  { %v812_v26 = vmax.f32 %v810_v18, %v811_v22  ;;  %v817_v27 = vmax.f32 %v815_v19, %v816_v24  ;;  %v822_v23 = vmax.f32 %v792_v25, %v1431_v21  ;;  %v837_v36 = vmul.f32 1.442695, %v829_v29 }
 0x458   :  { %v839_v42 = vmul.f32 1.442695, %v830_v33 }
 0x459   :  { %v813_v30 = vrot.slane %v812_v26, 1  ;;  %v818_v31 = vrot.slane %v817_v27, 2  ;;  %v823_v32 = vrot.slane %v822_v23, 4  ;;  %1475 = vpow2.f32 %v837_v36 }
 0x45b   :  { %v814_v34 = vmax.f32 %v812_v26, %v813_v30  ;;  %v819_v35 = vmax.f32 %v817_v27, %v818_v31  ;;  %v824_v37 = vmax.f32 %v822_v23, %v823_v32 }
 0x45d   :  { %v831_v38 = vsub.f32 %v772_v10, %v814_v34  ;;  %v832_v39 = vsub.f32 %v1425_v8, %v814_v34  ;;  %v820_v40 = vrot.slane %v819_v35, 1  ;;  %v825_v41 = vrot.slane %v824_v37, 2  ;;  %v900_v34 = vld [vmem:[%s1877_s10 + $0x38] sm:$0xff] }
 0x45f   :  { %v841_v44 = vmul.f32 1.442695, %v831_v38  ;;  %v843_v45 = vmul.f32 1.442695, %v832_v39  ;;  %v821_v46 = vmax.f32 %v819_v35, %v820_v40  ;;  %v826_v47 = vmax.f32 %v824_v37, %v825_v41  ;;  %v899_v37 = vld [vmem:[%s1877_s10 + $0x30] sm:$0xff]  ;;  %v898_v41 = vld [vmem:[%s1877_s10 + $0x28] sm:$0xff] }
 0x461   :  { %1477 = vpow2.f32 %v841_v44  ;;  %v833_v48 = vsub.f32 %v782_v17, %v821_v46  ;;  %v834_v49 = vsub.f32 %v1428_v13, %v821_v46  ;;  %v827_v50 = vrot.slane %v826_v47, 1 }
 0x462   :  { %1479 = vpow2.f32 %v843_v45  ;;  %v897_v45 = vld [vmem:[%s1877_s10 + $0x20] sm:$0xff] }
 0x463   :  { %1481 = vpow2.f32 %v839_v42  ;;  %v845_v51 = vmul.f32 1.442695, %v833_v48  ;;  %v847_v52 = vmul.f32 1.442695, %v834_v49  ;;  %v828_v53 = vmax.f32 %v826_v47, %v827_v50  ;;  %v896_v49 = vld [vmem:[%s1877_s10 + $0x18] sm:$0xff] }
 0x465   :  { %1483 = vpow2.f32 %v845_v51  ;;  %v835_v54 = vsub.f32 %v792_v25, %v828_v53  ;;  %v836_v55 = vsub.f32 %v1431_v21, %v828_v53 }
 0x466   :  { %1485 = vpow2.f32 %v847_v52  ;;  %v1827_v58 = vpop.eup %1475  ;;  %v895_v52 = vld [vmem:[%s1877_s10 + $0x10] sm:$0xff] }
 0x467   :  { %v849_v56 = vmul.f32 1.442695, %v835_v54  ;;  %v851_v57 = vmul.f32 1.442695, %v836_v55  ;;  %v894_v55 = vld [vmem:[%s1877_s10 + $0x8] sm:$0xff] }
 0x469   :  { %1487 = vpow2.f32 %v849_v56 }
 0x46a   :  { %1489 = vpow2.f32 %v851_v57 }
 0x46e   :  { %v1478_v59 = vpop.eup %1477 }
 0x46f   :  { %v1480_v60 = vpop.eup %1479 }
 0x470   :  { %v1829_v61 = vpop.eup %1481  ;;  %v860_v62 = vadd.f32 %v1480_v60, %v1478_v59 }
 0x471   :  { %v853_v1 = vadd.f32 %v1829_v61, %v1827_v58 }
 0x472   :  { %v1484_v63 = vpop.eup %1483  ;;  %v861_v2 = vrot.slane %v860_v62, 4 }
 0x473   :  { %v1486_v0 = vpop.eup %1485  ;;  %v854_v6 = vrot.slane %v853_v1, 4 }
 0x474   :  { %v867_v3 = vadd.f32 %v1486_v0, %v1484_v63  ;;  %v862_v7 = vadd.f32 %v861_v2, %v860_v62 }
 0x475   :  { %v855_v12 = vadd.f32 %v854_v6, %v853_v1 }
 0x476   :  { %v868_v4 = vrot.slane %v867_v3, 4  ;;  %v1488_v5 = vpop.eup %1487  ;;  %v863_v13 = vrot.slane %v862_v7, 2 }
 0x477   :  { %v1490_v8 = vpop.eup %1489  ;;  %v856_v19 = vrot.slane %v855_v12, 2 }
 0x478   :  { %v869_v9 = vadd.f32 %v868_v4, %v867_v3  ;;  %v874_v10 = vadd.f32 %v1490_v8, %v1488_v5  ;;  %v864_v20 = vadd.f32 %v863_v13, %v862_v7 }
 0x479   :  { %v857_v25 = vadd.f32 %v856_v19, %v855_v12 }
 0x47a   :  { %v870_v11 = vrot.slane %v869_v9, 2  ;;  %v875_v14 = vrot.slane %v874_v10, 4  ;;  %v865_v27 = vrot.slane %v864_v20, 1 }
 0x47b   :  { %v858_v30 = vrot.slane %v857_v25, 1 }
 0x47c   :  { %v871_v15 = vadd.f32 %v870_v11, %v869_v9  ;;  %v876_v17 = vadd.f32 %v875_v14, %v874_v10  ;;  %v866_v23 = vadd.f32 %v865_v27, %v864_v20 }
 0x47d   :  { %v859_v31 = vadd.f32 %v858_v30, %v857_v25 }
 0x47e   :  { %v872_v18 = vrot.slane %v871_v15, 1  ;;  %v877_v21 = vrot.slane %v876_v17, 2 }
 0x480   :  { %v878_v22 = vadd.f32 %v877_v21, %v876_v17  ;;  %v873_v24 = vadd.f32 %v872_v18, %v871_v15 }
 0x482   :  { %v879_v26 = vrot.slane %v878_v22, 1  ;;  %1491 = vrcp.f32 %v873_v24 }
 0x484   :  { %v880_v29 = vadd.f32 %v879_v26, %v878_v22 }
 0x486   :  { %1493 = vrcp.f32 %v880_v29 }
 0x487   :  { %1495 = vrcp.f32 %v866_v23 }
 0x488   :  { %1497 = vrcp.f32 %v859_v31 }
 0x48f   :  { %v1492_v32 = vpop.eup %1491 }
 0x490   :  { %v890_v39 = vmul.f32 %v1492_v32, %v1486_v0  ;;  %v889_v44 = vmul.f32 %v1492_v32, %v1484_v63 }
 0x492   :  { %v906_v46 = vmul.f32 %v898_v41, %v890_v39  ;;  %v905_v50 = vmul.f32 %v897_v45, %v889_v44 }
 0x493   :  { %v1494_v33 = vpop.eup %1493 }
 0x494   :  { %v892_v35 = vmul.f32 %v1494_v33, %v1490_v8  ;;  %v891_v36 = vmul.f32 %v1494_v33, %v1488_v5  ;;  %v1496_v40 = vpop.eup %1495 }
 0x495   :  { %v888_v47 = vmul.f32 %v1496_v40, %v1480_v60  ;;  %v1498_v48 = vpop.eup %1497  ;;  %v887_v51 = vmul.f32 %v1496_v40, %v1478_v59  ;;  %v893_v59 = vld [vmem:[%s1877_s10] sm:$0xff]  ;;  %s1177_s10 = sshll.u32 %s1525_s15, 4  ;;  %s1178_s10 = int_to_ptr.vmem [resolvable:$true] %s1177_s10 }
 0x496   :  { %v908_v38 = vmul.f32 %v900_v34, %v892_v35  ;;  %v907_v42 = vmul.f32 %v899_v37, %v891_v36  ;;  %v886_v54 = vmul.f32 %v1498_v48, %v1829_v61  ;;  %v885_v57 = vmul.f32 %v1498_v48, %v1827_v58  ;;  %v1081_v61 = vpop.permute.xlu1 %1080  ;;  %s1499_s16 = scalar_lea.vmem %s1178_s10, 256  ;;  %p1504_p1 = scmp.lt.s32.totalorder %s1178_s10, %s1178_s10 }
 0x497   :  { %v904_v53 = vmul.f32 %v896_v49, %v888_v47  ;;  %v903_v56 = vmul.f32 %v895_v52, %v887_v51  ;;  %v1085_v63 = vsel %vm421_vm3, %v1803_v43, %v1081_v61  ;;  %p1500_p0 = scmp.ne.s32.totalorder %s1178_s10, %s1499_s16  ;;  %p1505_p2 = scmp.lt.s32.totalorder %s1499_s16, %s1499_s16 }
 0x498   :  { %1446 = vmatprep.subr.mxu1 %v908_v38  ;;  %v902_v60 = vmul.f32 %v894_v55, %v886_v54  ;;  %v901_v62 = vmul.f32 %v893_v59, %v885_v57 }
 0x499   :  { %1447 = vmatpush3.msra.mxu1 %v908_v38  ;;  %p1506_p3 = por %p1505_p2, %p1504_p1 }
 0x49a   :  { %1448 = vmatprep.subr.mxu1 %v907_v42  ;;  %v242_v58 = vpop.permute.xlu1 %241 }
 0x49b   :  { %1449 = vmatpush3.msra.mxu1 %v907_v42  ;;  %v322_v3 = vadd.f32 %v1779_v16, %v242_v58  ;;  %p1507_p4 = pnand %p1506_p3, %p1500_p0 }
 0x49c   :  { %1450 = vmatprep.subr.mxu1 %v906_v46 }
 0x49d   :  { %1451 = vmatpush3.msra.mxu1 %v906_v46 }
 0x49e   :  { %1452 = vmatprep.subr.mxu1 %v905_v50  ;;  %v247_v0 = vpop.permute.xlu1 %246 }
 0x49f   :  { %1453 = vmatpush3.msra.mxu1 %v905_v50  ;;  %v327_v1 = vadd.f32 %v1777_v28, %v247_v0 }
 0x4a0   :  { %1454 = vmatprep.subr.mxu1 %v904_v53 }
 0x4a1   :  { %1455 = vmatpush3.msra.mxu1 %v904_v53 }
 0x4a2   :  { %1456 = vmatprep.subr.mxu1 %v903_v56 }
 0x4a3   :  { %1457 = vmatpush3.msra.mxu1 %v903_v56 }
 0x4a4   :  { %1458 = vmatprep.subr.mxu1 %v902_v60 }
 0x4a5   :  { %1459 = vmatpush3.msra.mxu1 %v902_v60 }
 0x4a6   :  { %1460 = vmatprep.subr.mxu1 %v901_v62 }
 0x4a7   :  { %1461 = vmatpush3.msra.mxu1 %v901_v62 }
 0x4a8   :  { %1463 = vmatmul.mubr.msk.f32.vlgmr.msra.gmra.mxu1 %vm1086_vm4, %v1085_v63 }
 0x568   :  { %v1464_v2 = vpop.f32.mrf.mxu1 }
 0x569   :  { %v1169_v4 = vadd.f32 %v1464_v2, %v327_v1 }
 0x56a   :  { %v1159_v5 = vpop.f32.mrf.mxu1 }
 0x56b   :  { %1171 = vst [vmem:[#allocation3 + $0x8] sm:$0xff] %v1169_v4  ;;  %v1168_v6 = vadd.f32 %v1159_v5, %v322_v3 }
 0x56d   :  { %1170 = vst [vmem:[#allocation3] sm:$0xff] %v1168_v6 }
 0x56e   :  { %1510 = shalt.err (!%p1507_p4)
}
 0x56f   :  { %s1526_s4 = smov 128   ;;  %s1527_s17 = smov 8  }
 0x570   :  { %1183 = dma.vmem_to_hbm [thread:$0]  %s1178_s10, 256, %s1878_s11, [#allocation4], %s1526_s4, %s1526_s4, %s1527_s17  }
 0x571   :  { %1519 = dma.done.wait [#allocation4], 256  }
 0x572   :  { %1520 = vsyncadd [#allocation4], 4294967040 }
 0x573   :  { %1187 = vsyncpa [#allocation4], 1 }

</bundles_post_ra>
